<compile_context>
chip_gen: v5e
topology: v5e:2x2
jax: 0.10.0
libtpu: 0.0.40
codegen_flags: <defaults>
</compile_context>

<pallas_src>
import jax
import jax.numpy as jnp
from jax.experimental import pallas as pl
from jax.experimental.pallas import tpu as pltpu


def _round_up(v, m):
    return (v + m - 1) // m * m


def _relu6(x):
    return jnp.minimum(jnp.maximum(x, 0.0), 6.0)


def decode_layer_kernel(x_ref, w1_ref, b1_ref, w2_ref, b2_ref, w3_ref, b3_ref, o_ref):
    """Fused 3-layer MLP on one row tile.

    All three matmuls hit the MXU (f32 accumulation); bias add + ReLU6 clamp
    run on the f32 accumulator on the VPU; activations are downcast to the
    weight dtype only once per layer boundary.
    """
    w_dtype = w1_ref.dtype

    x = x_ref[...]
    if x.dtype != w_dtype:
        x = x.astype(w_dtype)

    h = jnp.dot(x, w1_ref[...], preferred_element_type=jnp.float32)
    h = _relu6(h + b1_ref[...].astype(jnp.float32))

    h = jnp.dot(h.astype(w_dtype), w2_ref[...], preferred_element_type=jnp.float32)
    h = _relu6(h + b2_ref[...].astype(jnp.float32))

    o = jnp.dot(h.astype(w_dtype), w3_ref[...], preferred_element_type=jnp.float32)
    o = o + b3_ref[...].astype(jnp.float32)
    o_ref[...] = o.astype(o_ref.dtype)


def decode_layer(x, params, *, row_tile=512):
    """x: (..., in_channel). params: dict with w1,b1,w2,b2,w3,b3 (w as (fan_in, fan_out))."""
    w1, b1, w2, b2, w3, b3 = (params[k] for k in ("w1", "b1", "w2", "b2", "w3", "b3"))
    in_c = w1.shape[0]
    mid_c = w1.shape[1]
    out_c = w3.shape[1]

    # Lane-dense channel padding (exact: zeros contribute nothing through the
    # Linear/ReLU6 chain). Only the tiny weight/bias tensors are padded; x is
    # not padded on its channel dim (its block equals the full in_c extent,
    # which satisfies the (8,128) block rule).
    mid_p = _round_up(mid_c, 128)
    out_p = _round_up(out_c, 128)

    w1p = jnp.pad(w1, ((0, 0), (0, mid_p - mid_c)))
    b1p = jnp.pad(b1.reshape(1, -1), ((0, 0), (0, mid_p - mid_c)))
    w2p = jnp.pad(w2, ((0, mid_p - mid_c), (0, mid_p - mid_c)))
    b2p = jnp.pad(b2.reshape(1, -1), ((0, 0), (0, mid_p - mid_c)))
    w3p = jnp.pad(w3, ((0, mid_p - mid_c), (0, out_p - out_c)))
    b3p = jnp.pad(b3.reshape(1, -1), ((0, 0), (0, out_p - out_c)))

    lead_shape = x.shape[:-1]
    x2d = x.reshape(-1, in_c)
    n = x2d.shape[0]

    # Row tile: as large as allowed (amortize per-step pipeline overhead),
    # clamped to the 8-aligned row count so small problems become grid=(1,).
    row_tile = max(8, min(_round_up(row_tile, 8), _round_up(n, 8)))
    n_pad = -n % row_tile
    if n_pad:
        # Padded rows produce garbage values but are sliced off below.
        x2d = jnp.pad(x2d, ((0, n_pad), (0, 0)))
    n_total = x2d.shape[0]
    grid = (n_total // row_tile,)

    out2d = pl.pallas_call(
        decode_layer_kernel,
        out_shape=jax.ShapeDtypeStruct((n_total, out_p), x.dtype),
        grid_spec=pltpu.PrefetchScalarGridSpec(
            num_scalar_prefetch=0,
            grid=grid,
            in_specs=[
                pl.BlockSpec((row_tile, in_c), lambda i: (i, 0)),   # x row tile
                pl.BlockSpec((in_c, mid_p), lambda i: (0, 0)),      # w1 (resident)
                pl.BlockSpec((1, mid_p), lambda i: (0, 0)),         # b1
                pl.BlockSpec((mid_p, mid_p), lambda i: (0, 0)),     # w2
                pl.BlockSpec((1, mid_p), lambda i: (0, 0)),         # b2
                pl.BlockSpec((mid_p, out_p), lambda i: (0, 0)),     # w3
                pl.BlockSpec((1, out_p), lambda i: (0, 0)),         # b3
            ],
            out_specs=pl.BlockSpec((row_tile, out_p), lambda i: (i, 0)),
        ),
        compiler_params=pltpu.CompilerParams(
            dimension_semantics=("parallel",),
        ),
    )(x2d, w1p, b1p, w2p, b2p, w3p, b3p)

    out2d = out2d[:n, :out_c]
    return out2d.reshape(*lead_shape, out_c)


def init_decode_layer_params(key, in_channel, mid_channel, out_channel, dtype=jnp.float32):
    """Deterministic init mimicking torch.nn.Linear default (U[-1/sqrt(fan_in), 1/sqrt(fan_in)]).
    Weights stored as (fan_in, fan_out) so the kernel computes x @ W + b."""
    ks = jax.random.split(key, 6)

    def lin(kw, kb, fan_in, fan_out):
        bound = 1.0 / jnp.sqrt(float(fan_in))
        w = jax.random.uniform(kw, (fan_in, fan_out), dtype, -bound, bound)
        b = jax.random.uniform(kb, (fan_out,), dtype, -bound, bound)
        return w, b

    w1, b1 = lin(ks[0], ks[1], in_channel, mid_channel)
    w2, b2 = lin(ks[2], ks[3], mid_channel, mid_channel)
    w3, b3 = lin(ks[4], ks[5], mid_channel, out_channel)
    return dict(w1=w1, b1=b1, w2=w2, b2=b2, w3=w3, b3=b3)


def decode_layer_ref(x, params):
    """Plain-JAX reference matching the PyTorch DecodeLayer forward."""
    h = x @ params["w1"] + params["b1"]
    h = jnp.clip(h, 0.0, 6.0)
    h = h @ params["w2"] + params["b2"]
    h = jnp.clip(h, 0.0, 6.0)
    return h @ params["w3"] + params["b3"]


if __name__ == "__main__":
    key = jax.random.PRNGKey(0)
    k_x, k_p = jax.random.split(key)

    # Small shapes consistent with the module: tokens of dim in_channel.
    batch, seq = 2, 8
    in_channel, mid_channel, out_channel = 32, 32, 16

    x = jax.random.normal(k_x, (batch, seq, in_channel), jnp.float32)
    params = init_decode_layer_params(k_p, in_channel, mid_channel, out_channel)

    out = decode_layer(x, params)
    out = jax.block_until_ready(out)

    ref = decode_layer_ref(x, params)
    assert out.shape == (batch, seq, out_channel)
    assert jnp.allclose(out, ref, atol=1e-5, rtol=1e-5)

    print("KERNEL_OK")
</pallas_src>

<mosaic_0001>
module attributes {stable_mosaic.version = 11 : i64} {
  func.func @decode_layer_kernel(%arg0: i32, %arg1: memref<16x32xf32, #tpu.memory_space<vmem>>, %arg2: memref<32x128xf32, #tpu.memory_space<vmem>>, %arg3: memref<1x128xf32, #tpu.memory_space<vmem>>, %arg4: memref<128x128xf32, #tpu.memory_space<vmem>>, %arg5: memref<1x128xf32, #tpu.memory_space<vmem>>, %arg6: memref<128x128xf32, #tpu.memory_space<vmem>>, %arg7: memref<1x128xf32, #tpu.memory_space<vmem>>, %arg8: memref<16x128xf32, #tpu.memory_space<vmem>>) attributes {dimension_semantics = [#tpu.dimension_semantics<parallel>], iteration_bounds = array<i64: 1>, scalar_prefetch = 0 : i64, scratch_operands = 0 : i64, tpu.core_type = #tpu.core_type<tc>, window_params = [{transform_indices = @transform_0, window_bounds = array<i64: 16, 32>}, {pipeline_mode = #tpu.pipeline_mode<synchronous>, transform_indices = @transform_1, window_bounds = array<i64: 32, 128>}, {pipeline_mode = #tpu.pipeline_mode<synchronous>, transform_indices = @transform_2, window_bounds = array<i64: 1, 128>}, {pipeline_mode = #tpu.pipeline_mode<synchronous>, transform_indices = @transform_3, window_bounds = array<i64: 128, 128>}, {pipeline_mode = #tpu.pipeline_mode<synchronous>, transform_indices = @transform_4, window_bounds = array<i64: 1, 128>}, {pipeline_mode = #tpu.pipeline_mode<synchronous>, transform_indices = @transform_5, window_bounds = array<i64: 128, 128>}, {pipeline_mode = #tpu.pipeline_mode<synchronous>, transform_indices = @transform_6, window_bounds = array<i64: 1, 128>}, {transform_indices = @transform_7, window_bounds = array<i64: 16, 128>}]} {
    %c0 = arith.constant 0 : index
    %c0_0 = arith.constant 0 : index
    %0 = vector.load %arg1[%c0, %c0_0] : memref<16x32xf32, #tpu.memory_space<vmem>>, vector<16x32xf32>
    %c0_1 = arith.constant 0 : index
    %c0_2 = arith.constant 0 : index
    %1 = vector.load %arg2[%c0_1, %c0_2] : memref<32x128xf32, #tpu.memory_space<vmem>>, vector<32x128xf32>
    %cst = arith.constant dense<0.000000e+00> : vector<16x128xf32>
    %2 = tpu.matmul %0, %1, %cst {dimension_numbers = #tpu.dot_dimension_numbers<[1], [0], [0], [1], [0, 0, 1, 1], [], []>} : vector<16x32xf32>, vector<32x128xf32>, vector<16x128xf32> -> vector<16x128xf32>
    %c0_3 = arith.constant 0 : index
    %c0_4 = arith.constant 0 : index
    %3 = vector.load %arg3[%c0_3, %c0_4] : memref<1x128xf32, #tpu.memory_space<vmem>>, vector<1x128xf32>
    %4 = vector.broadcast %3 : vector<1x128xf32> to vector<16x128xf32>
    %5 = arith.addf %2, %4 : vector<16x128xf32>
    %cst_5 = arith.constant 0.000000e+00 : f32
    %6 = vector.broadcast %cst_5 : f32 to vector<16x128xf32>
    %7 = arith.maximumf %5, %6 : vector<16x128xf32>
    %cst_6 = arith.constant 6.000000e+00 : f32
    %8 = vector.broadcast %cst_6 : f32 to vector<16x128xf32>
    %9 = arith.minimumf %7, %8 : vector<16x128xf32>
    %c0_7 = arith.constant 0 : index
    %c0_8 = arith.constant 0 : index
    %10 = vector.load %arg4[%c0_7, %c0_8] : memref<128x128xf32, #tpu.memory_space<vmem>>, vector<128x128xf32>
    %cst_9 = arith.constant dense<0.000000e+00> : vector<16x128xf32>
    %11 = tpu.matmul %9, %10, %cst_9 {dimension_numbers = #tpu.dot_dimension_numbers<[1], [0], [0], [1], [0, 0, 1, 1], [], []>} : vector<16x128xf32>, vector<128x128xf32>, vector<16x128xf32> -> vector<16x128xf32>
    %c0_10 = arith.constant 0 : index
    %c0_11 = arith.constant 0 : index
    %12 = vector.load %arg5[%c0_10, %c0_11] : memref<1x128xf32, #tpu.memory_space<vmem>>, vector<1x128xf32>
    %13 = vector.broadcast %12 : vector<1x128xf32> to vector<16x128xf32>
    %14 = arith.addf %11, %13 : vector<16x128xf32>
    %cst_12 = arith.constant 0.000000e+00 : f32
    %15 = vector.broadcast %cst_12 : f32 to vector<16x128xf32>
    %16 = arith.maximumf %14, %15 : vector<16x128xf32>
    %cst_13 = arith.constant 6.000000e+00 : f32
    %17 = vector.broadcast %cst_13 : f32 to vector<16x128xf32>
    %18 = arith.minimumf %16, %17 : vector<16x128xf32>
    %c0_14 = arith.constant 0 : index
    %c0_15 = arith.constant 0 : index
    %19 = vector.load %arg6[%c0_14, %c0_15] : memref<128x128xf32, #tpu.memory_space<vmem>>, vector<128x128xf32>
    %cst_16 = arith.constant dense<0.000000e+00> : vector<16x128xf32>
    %20 = tpu.matmul %18, %19, %cst_16 {dimension_numbers = #tpu.dot_dimension_numbers<[1], [0], [0], [1], [0, 0, 1, 1], [], []>} : vector<16x128xf32>, vector<128x128xf32>, vector<16x128xf32> -> vector<16x128xf32>
    %c0_17 = arith.constant 0 : index
    %c0_18 = arith.constant 0 : index
    %21 = vector.load %arg7[%c0_17, %c0_18] : memref<1x128xf32, #tpu.memory_space<vmem>>, vector<1x128xf32>
    %22 = vector.broadcast %21 : vector<1x128xf32> to vector<16x128xf32>
    %23 = arith.addf %20, %22 : vector<16x128xf32>
    %c0_19 = arith.constant 0 : index
    %c0_20 = arith.constant 0 : index
    %24 = vector.load %arg8[%c0_19, %c0_20] : memref<16x128xf32, #tpu.memory_space<vmem>>, vector<16x128xf32>
    tpu.vector_store %arg8[%c0_19, %c0_20], %23 {strides = array<i32>} : memref<16x128xf32, #tpu.memory_space<vmem>>, vector<16x128xf32>,
    return
  }
  func.func @transform_0(%arg0: i32) -> (i32, i32) {
    %c0_i32 = arith.constant 0 : i32
    %c0_i32_0 = arith.constant 0 : i32
    return %arg0, %c0_i32 : i32, i32
  }
  func.func @transform_1(%arg0: i32) -> (i32, i32) {
    %c0_i32 = arith.constant 0 : i32
    %c0_i32_0 = arith.constant 0 : i32
    %c0_i32_1 = arith.constant 0 : i32
    return %c0_i32, %c0_i32_0 : i32, i32
  }
  func.func @transform_2(%arg0: i32) -> (i32, i32) {
    %c0_i32 = arith.constant 0 : i32
    %c0_i32_0 = arith.constant 0 : i32
    %c0_i32_1 = arith.constant 0 : i32
    return %c0_i32, %c0_i32_0 : i32, i32
  }
  func.func @transform_3(%arg0: i32) -> (i32, i32) {
    %c0_i32 = arith.constant 0 : i32
    %c0_i32_0 = arith.constant 0 : i32
    %c0_i32_1 = arith.constant 0 : i32
    return %c0_i32, %c0_i32_0 : i32, i32
  }
  func.func @transform_4(%arg0: i32) -> (i32, i32) {
    %c0_i32 = arith.constant 0 : i32
    %c0_i32_0 = arith.constant 0 : i32
    %c0_i32_1 = arith.constant 0 : i32
    return %c0_i32, %c0_i32_0 : i32, i32
  }
  func.func @transform_5(%arg0: i32) -> (i32, i32) {
    %c0_i32 = arith.constant 0 : i32
    %c0_i32_0 = arith.constant 0 : i32
    %c0_i32_1 = arith.constant 0 : i32
    return %c0_i32, %c0_i32_0 : i32, i32
  }
  func.func @transform_6(%arg0: i32) -> (i32, i32) {
    %c0_i32 = arith.constant 0 : i32
    %c0_i32_0 = arith.constant 0 : i32
    %c0_i32_1 = arith.constant 0 : i32
    return %c0_i32, %c0_i32_0 : i32, i32
  }
  func.func @transform_7(%arg0: i32) -> (i32, i32) {
    %c0_i32 = arith.constant 0 : i32
    %c0_i32_0 = arith.constant 0 : i32
    return %arg0, %c0_i32 : i32, i32
  }
}

</mosaic_0001>

<bundles_post_ra>
// kernel: tpu_custom_call.1
= control target key start
LH: loop header
LB: loop body
LE: loop exit
PB: predicated region body
PF: predicated region fallthrough
CT: control target
= control target key end

     0   :  { %12 = vsyncpa [#allocation3], 0  ;;  %s491_s0 = inlined_call_operand.hbm [shape: f32[16,32], index: 0, kind: input, shape index: {}]   ;;  %s492_s1 = inlined_call_operand.hbm [shape: f32[32,128], index: 1, kind: input, shape index: {}]   ;;  %s493_s2 = inlined_call_operand.vmem [shape: f32[1,128], index: 2, kind: input, shape index: {}]   ;;  %s494_s3 = inlined_call_operand.hbm [shape: f32[128,128], index: 3, kind: input, shape index: {}]   ;;  %s495_s4 = inlined_call_operand.vmem [shape: f32[1,128], index: 4, kind: input, shape index: {}]   ;;  %s496_s5 = inlined_call_operand.hbm [shape: f32[128,128], index: 5, kind: input, shape index: {}]   ;;  %s497_s6 = inlined_call_operand.vmem [shape: f32[1,128], index: 6, kind: input, shape index: {}]   ;;  %s498_s7 = inlined_call_operand.hbm [shape: f32[16,128], index: 7, kind: output, shape index: {}]  }
   0x1   :  { %13 = vsyncpa [#allocation6], 0 }
   0x2   :  { %14 = vsyncpa [#allocation9], 0 }
   0x3   :  { %15 = vsyncpa [#allocation4], 0  ;;  %s33_s26 = sshll.u32 %s492_s1, 4  ;;  %s403_s27 = smov [#allocation5]   ;;  %s34_s26 = int_to_ptr.hbm [resolvable:$true] %s33_s26 }
   0x4   :  { %s35_s28 = sshll.u32 %s403_s27, 4  ;;  %s20_s8 = sshll.u32 %s491_s0, 4  ;;  %s36_s28 = int_to_ptr.vmem [resolvable:$true] %s35_s28  ;;  %s21_s8 = int_to_ptr.hbm [resolvable:$true] %s20_s8 }
   0x5   :  { %s404_s9 = smov 128   ;;  %s405_s10 = smov 8  }
   0x6   :  { %41 = dma.hbm_to_vmem [thread:$0]  %s34_s26, 512, %s36_s28, [#allocation6], %s404_s9, %s404_s9, %s405_s10  }
   0x7   :  { %s406_s11 = smov [#allocation2]   ;;  %s48_s1 = sshll.u32 %s494_s3, 4  ;;  %s49_s1 = int_to_ptr.hbm [resolvable:$true] %s48_s1 }
   0x8   :  { %s22_s12 = sshll.u32 %s406_s11, 4  ;;  %s63_s16 = sshll.u32 %s496_s5, 4  ;;  %s23_s12 = int_to_ptr.vmem [resolvable:$true] %s22_s12  ;;  %s64_s16 = int_to_ptr.hbm [resolvable:$true] %s63_s16 }
   0x9   :  { %28 = dma.hbm_to_vmem [thread:$0]  %s21_s8, 256, %s23_s12, [#allocation3], %s404_s9, %s404_s9, %s405_s10  }
   0xa   :  { %s407_s17 = smov [#allocation7]   ;;  %s408_s19 = smov [#allocation8]  }
   0xb   :  { %s50_s18 = sshll.u32 %s407_s17, 4  ;;  %s65_s3 = sshll.u32 %s408_s19, 4  ;;  %s51_s18 = int_to_ptr.vmem [resolvable:$true] %s50_s18  ;;  %s66_s3 = int_to_ptr.vmem [resolvable:$true] %s65_s3 }
   0xc   :  { %56 = dma.hbm_to_vmem [thread:$0]  %s49_s1, 2048, %s51_s18, [#allocation6], %s404_s9, %s404_s9, %s405_s10  }
   0xd   :  { %71 = dma.hbm_to_vmem [thread:$0]  %s64_s16, 2048, %s66_s3, [#allocation9], %s404_s9, %s404_s9, %s405_s10  }
   0xe   :  { %395 = dma.done.wait [#allocation3], 256  }
   0xf   :  { %396 = vsyncadd [#allocation3], 4294967040 }
  0x10   :  { %397 = dma.done.wait [#allocation6], 2560  }
  0x11   :  { %398 = vsyncadd [#allocation6], 4294964736 }
  0x12   :  { %399 = dma.done.wait [#allocation9], 2048  }
  0x13   :  { %400 = vsyncadd [#allocation9], 4294965248  ;;  %v95_v0 = vld [vmem:[#allocation5 + $0x18] sm:$0xff]  ;;  %v94_v1 = vld [vmem:[#allocation5 + $0x10] sm:$0xff]  ;;  %vm100_vm0 = vcmask 261120   ;;  %s409_s24 = smov [#allocation10]  }
  0x14   :  { %119 = vmatpush.msra.mxu0 %v95_v0  ;;  %v93_v2 = vld [vmem:[#allocation5 + $0x8] sm:$0xff]  ;;  %v149_v3 = vld [vmem:[#allocation7 + $0x78] sm:$0xff]  ;;  %v148_v4 = vld [vmem:[#allocation7 + $0x70] sm:$0xff]  ;;  %s230_s25 = sshll.u32 %s409_s24, 4  ;;  %s232_s27 = sshll.u32 %s498_s7, 4  ;;  %s231_s25 = int_to_ptr.vmem [resolvable:$true] %s230_s25  ;;  %s233_s27 = int_to_ptr.hbm [resolvable:$true] %s232_s27 }
  0x15   :  { %154 = vmatpush.msra.mxu1 %v149_v3  ;;  %v92_v5 = vld [vmem:[#allocation5] sm:$0xff]  ;;  %v147_v6 = vld [vmem:[#allocation7 + $0x68] sm:$0xff]  ;;  %249 = vmatpush.msra.mxu3 %v149_v3  ;;  %v90_v7 = vld [vmem:[#allocation2] sm:$0xff] }
  0x16   :  { %120 = vmatpush.msra.mxu0 %v94_v1  ;;  %v146_v8 = vld [vmem:[#allocation7 + $0x60] sm:$0xff]  ;;  %v145_v9 = vld [vmem:[#allocation7 + $0x58] sm:$0xff]  ;;  %v144_v10 = vld [vmem:[#allocation7 + $0x50] sm:$0xff] }
  0x17   :  { %155 = vmatpush.msra.mxu1 %v148_v4  ;;  %250 = vmatpush.msra.mxu3 %v148_v4  ;;  %v143_v11 = vld [vmem:[#allocation7 + $0x48] sm:$0xff]  ;;  %v91_v12 = vld [vmem:[#allocation2 + $0x8] sm:$0xff]  ;;  %v142_v13 = vld [vmem:[#allocation7 + $0x40] sm:$0xff] }
  0x18   :  { %121 = vmatpush.msra.mxu0 %v93_v2  ;;  %v141_v14 = vld [vmem:[#allocation7 + $0x38] sm:$0xff]  ;;  %v140_v15 = vld [vmem:[#allocation7 + $0x30] sm:$0xff]  ;;  %v139_v16 = vld [vmem:[#allocation7 + $0x28] sm:$0xff] }
  0x19   :  { %156 = vmatpush.msra.mxu1 %v147_v6  ;;  %251 = vmatpush.msra.mxu3 %v147_v6  ;;  %v138_v17 = vld [vmem:[#allocation7 + $0x20] sm:$0xff]  ;;  %v137_v18 = vld [vmem:[#allocation7 + $0x18] sm:$0xff]  ;;  %v136_v19 = vld [vmem:[#allocation7 + $0x10] sm:$0xff] }
  0x1a   :  { %122 = vmatpush.msra.mxu0 %v92_v5  ;;  %v135_v20 = vld [vmem:[#allocation7 + $0x8] sm:$0xff]  ;;  %v134_v21 = vld [vmem:[#allocation7] sm:$0xff]  ;;  %v196_v22 = vld [vmem:[#allocation8 + $0x78] sm:$0xff] }
  0x1b   :  { %247 = vmatmul.msk.f32.vlgmr.msra.gmra.mxu0 %vm100_vm0, %v90_v7  ;;  %157 = vmatpush.msra.mxu1 %v146_v8  ;;  %v195_v23 = vld [vmem:[#allocation8 + $0x70] sm:$0xff]  ;;  %v194_v24 = vld [vmem:[#allocation8 + $0x68] sm:$0xff]  ;;  %v193_v25 = vld [vmem:[#allocation8 + $0x60] sm:$0xff] }
  0x1c   :  { %252 = vmatpush.msra.mxu3 %v146_v8  ;;  %201 = vmatpush.msra.mxu2 %v196_v22  ;;  %v192_v26 = vld [vmem:[#allocation8 + $0x58] sm:$0xff]  ;;  %v191_v27 = vld [vmem:[#allocation8 + $0x50] sm:$0xff]  ;;  %v190_v28 = vld [vmem:[#allocation8 + $0x48] sm:$0xff] }
  0x1d   :  { %158 = vmatpush.msra.mxu1 %v145_v9  ;;  %v189_v29 = vld [vmem:[#allocation8 + $0x40] sm:$0xff]  ;;  %v272_v30 = vld [vmem:[%s493_s2] ss:$0 sm:$0xff]  ;;  %v188_v31 = vld [vmem:[#allocation8 + $0x38] sm:$0xff] }
  0x1e   :  { %253 = vmatpush.msra.mxu3 %v145_v9  ;;  %202 = vmatpush.msra.mxu2 %v195_v23  ;;  %v187_v32 = vld [vmem:[#allocation8 + $0x30] sm:$0xff]  ;;  %v186_v35 = vld [vmem:[#allocation8 + $0x28] sm:$0xff]  ;;  %v185_v37 = vld [vmem:[#allocation8 + $0x20] sm:$0xff] }
  0x1f   :  { %159 = vmatpush.msra.mxu1 %v144_v10  ;;  %v184_v43 = vld [vmem:[#allocation8 + $0x18] sm:$0xff]  ;;  %v183_v44 = vld [vmem:[#allocation8 + $0x10] sm:$0xff]  ;;  %v182_v45 = vld [vmem:[#allocation8 + $0x8] sm:$0xff] }
  0x20   :  { %254 = vmatpush.msra.mxu3 %v144_v10  ;;  %203 = vmatpush.msra.mxu2 %v194_v24  ;;  %v181_v46 = vld [vmem:[#allocation8] sm:$0xff]  ;;  %v273_v47 = vld [vmem:[%s495_s4] ss:$0 sm:$0xff] }
  0x21   :  { %160 = vmatpush.msra.mxu1 %v143_v11  ;;  %v274_v56 = vld [vmem:[%s497_s6] ss:$0 sm:$0xff] }
  0x22   :  { %255 = vmatpush.msra.mxu3 %v143_v11  ;;  %204 = vmatpush.msra.mxu2 %v193_v25 }
  0x23   :  { %248 = vmatmul.msk.f32.gmra.mxu0 %vm100_vm0, %v91_v12  ;;  %161 = vmatpush.msra.mxu1 %v142_v13 }
  0x24   :  { %256 = vmatpush.msra.mxu3 %v142_v13  ;;  %205 = vmatpush.msra.mxu2 %v192_v26 }
  0x25   :  { %162 = vmatpush.msra.mxu1 %v141_v14 }
  0x26   :  { %257 = vmatpush.msra.mxu3 %v141_v14  ;;  %206 = vmatpush.msra.mxu2 %v191_v27 }
  0x27   :  { %163 = vmatpush.msra.mxu1 %v140_v15 }
  0x28   :  { %258 = vmatpush.msra.mxu3 %v140_v15  ;;  %207 = vmatpush.msra.mxu2 %v190_v28 }
  0x29   :  { %164 = vmatpush.msra.mxu1 %v139_v16 }
  0x2a   :  { %259 = vmatpush.msra.mxu3 %v139_v16  ;;  %208 = vmatpush.msra.mxu2 %v189_v29 }
  0x2b   :  { %165 = vmatpush.msra.mxu1 %v138_v17 }
  0x2c   :  { %260 = vmatpush.msra.mxu3 %v138_v17  ;;  %209 = vmatpush.msra.mxu2 %v188_v31 }
  0x2d   :  { %166 = vmatpush.msra.mxu1 %v137_v18 }
  0x2e   :  { %261 = vmatpush.msra.mxu3 %v137_v18  ;;  %210 = vmatpush.msra.mxu2 %v187_v32 }
  0x2f   :  { %167 = vmatpush.msra.mxu1 %v136_v19 }
  0x30   :  { %262 = vmatpush.msra.mxu3 %v136_v19  ;;  %211 = vmatpush.msra.mxu2 %v186_v35 }
  0x31   :  { %168 = vmatpush.msra.mxu1 %v135_v20 }
  0x32   :  { %263 = vmatpush.msra.mxu3 %v135_v20  ;;  %212 = vmatpush.msra.mxu2 %v185_v37 }
  0x33   :  { %169 = vmatpush.msra.mxu1 %v134_v21 }
  0x34   :  { %264 = vmatpush.msra.mxu3 %v134_v21  ;;  %213 = vmatpush.msra.mxu2 %v184_v43 }
  0x36   :  { %214 = vmatpush.msra.mxu2 %v183_v44 }
  0x38   :  { %215 = vmatpush.msra.mxu2 %v182_v45 }
  0x3a   :  { %216 = vmatpush.msra.mxu2 %v181_v46 }
  0x98   :  { %v124_v33 = vpop.f32.mrf.mxu0 }
  0x99   :  { %v125_v34 = vadd.f32 %v272_v30, %v124_v33 }
  0x9b   :  { %v130_v36 = vmax.f32 %v125_v34, 0.0 }
  0x9d   :  { %v132_v38 = vmin.f32 %v130_v36, 6.0 }
  0x9f   :  { %170 = vmatmul.f32.vlgmr.msra.gmra.mxu1 %v132_v38 }
  0xa0   :  { %v127_v39 = vpop.f32.mrf.mxu0 }
  0xa1   :  { %v128_v40 = vadd.f32 %v272_v30, %v127_v39 }
  0xa3   :  { %v131_v41 = vmax.f32 %v128_v40, 0.0 }
  0xa5   :  { %v133_v42 = vmin.f32 %v131_v41, 6.0 }
  0xa7   :  { %173 = vmatmul.f32.vlgmr.msra.gmra.mxu3 %v133_v42 }
 0x11c   :  { %v171_v48 = vpop.f32.mrf.mxu1 }
 0x11d   :  { %v172_v49 = vadd.f32 %v273_v47, %v171_v48 }
 0x11f   :  { %v177_v50 = vmax.f32 %v172_v49, 0.0 }
 0x121   :  { %v179_v51 = vmin.f32 %v177_v50, 6.0 }
 0x123   :  { %217 = vmatmul.f32.vlgmr.msra.gmra.mxu2 %v179_v51 }
 0x12a   :  { %v174_v52 = vpop.f32.mrf.mxu3 }
 0x12b   :  { %v175_v53 = vadd.f32 %v273_v47, %v174_v52 }
 0x12d   :  { %v178_v54 = vmax.f32 %v175_v53, 0.0 }
 0x12f   :  { %v180_v55 = vmin.f32 %v178_v54, 6.0 }
 0x131   :  { %220 = vmatmul.f32.gmra.mxu2 %v180_v55 }
 0x1a6   :  { %v218_v57 = vpop.f32.mrf.mxu2 }
 0x1a7   :  { %v219_v58 = vadd.f32 %v274_v56, %v218_v57 }
 0x1a9   :  { %224 = vst [vmem:[#allocation10] sm:$0xff] %v219_v58 }
 0x1b4   :  { %v221_v59 = vpop.f32.mrf.mxu2 }
 0x1b5   :  { %v222_v60 = vadd.f32 %v274_v56, %v221_v59 }
 0x1b7   :  { %225 = vst [vmem:[#allocation10 + $0x8] sm:$0xff] %v222_v60 }
 0x1b8   :  { %238 = dma.vmem_to_hbm [thread:$0]  %s231_s25, 256, %s233_s27, [#allocation4], %s404_s9, %s404_s9, %s405_s10  }
 0x1b9   :  { %401 = dma.done.wait [#allocation4], 256  }
 0x1ba   :  { %402 = vsyncadd [#allocation4], 4294967040 }
 0x1bb   :  { %243 = vsyncpa [#allocation3], 1 }
 0x1bc   :  { %244 = vsyncpa [#allocation6], 1 }
 0x1bd   :  { %245 = vsyncpa [#allocation9], 1 }
 0x1be   :  { %246 = vsyncpa [#allocation4], 1 }

</bundles_post_ra>
